<compile_context>
chip_gen: v7x
topology: tpu7x:2x2x1
jax: 0.10.0
libtpu: 0.0.40
codegen_flags: <defaults>
</compile_context>

<pallas_src>
import functools

import jax
import jax.numpy as jnp
import numpy as np
from jax import lax
from jax.experimental import pallas as pl
from jax.experimental.pallas import tpu as pltpu

ALPHA = 2.0
GAMMA = 2.0

LANES = 128
SUBLANES = 8
TILE_ROWS_MAX = 1024  # (1024, 128) f32 tile = 512 KiB; x2 inputs x2 buffers = 2 MiB


def _focal_partial_kernel(pred_ref, tgt_ref, bce_out_ref, pow_out_ref, *,
                          gamma, total_rows, tile_rows, mask_tail):
    p = pred_ref[...].astype(jnp.float32)
    t = tgt_ref[...].astype(jnp.float32)

    if mask_tail:
        # Last grid step may read past the array; replace out-of-bounds rows
        # with the "zero contribution" value 1.0 BEFORE any log/NaN can appear.
        i = pl.program_id(0)
        row_ids = lax.broadcasted_iota(jnp.int32, (tile_rows, LANES), 0)
        valid = (i * tile_rows + row_ids) < total_rows
        p = jnp.where(valid, p, 1.0)
        t = jnp.where(valid, t, 1.0)

    # PyTorch F.binary_cross_entropy clamps the log terms at -100 (clamp must
    # happen before the multiply so 0 * (-100) = 0 instead of 0 * -inf = NaN).
    log_p = jnp.maximum(jnp.log(p), -100.0)
    log_1mp = jnp.maximum(jnp.log(1.0 - p), -100.0)
    bce_elem = -(t * log_p + (1.0 - t) * log_1mp)

    one_minus_p = 1.0 - p
    if gamma == 2.0:
        pow_elem = one_minus_p * one_minus_p      # VALU only, no pow/exp
    elif gamma == 1.0:
        pow_elem = one_minus_p
    else:
        pow_elem = one_minus_p ** gamma

    # Reduce (tile_rows, 128) -> (8, 128): pure vreg-aligned VALU adds, no XLU.
    groups = tile_rows // SUBLANES
    bce_out_ref[...] = bce_elem.reshape(groups, SUBLANES, LANES).sum(axis=0)
    pow_out_ref[...] = pow_elem.reshape(groups, SUBLANES, LANES).sum(axis=0)


def focal_loss(pred, target, alpha=ALPHA, gamma=GAMMA):
    assert pred.shape == target.shape
    n = int(np.prod(pred.shape))

    # Minimum granularity: one (8, 128) vreg tile of f32.
    block_elems = SUBLANES * LANES
    n_pad = -(-n // block_elems) * block_elems

    pred_flat = jnp.reshape(pred, (-1,))
    tgt_flat = jnp.reshape(target, (-1,))

    pad = n_pad - n
    if pad:
        # Only the ragged tail (< 1024 elements). Pad value 1.0 for BOTH pred
        # and target makes bce_elem and (1-p)**gamma exactly 0 -> no mask.
        pred_flat = jnp.pad(pred_flat, (0, pad), constant_values=1.0)
        tgt_flat = jnp.pad(tgt_flat, (0, pad), constant_values=1.0)

    rows = n_pad // LANES                      # multiple of 8
    tile_rows = min(TILE_ROWS_MAX, rows)       # multiple of 8
    grid_size = -(-rows // tile_rows)
    mask_tail = (rows % tile_rows) != 0

    pred2d = pred_flat.reshape(rows, LANES)    # no dtype cast here (keep bf16 etc.)
    tgt2d = tgt_flat.reshape(rows, LANES)

    in_spec = pl.BlockSpec((tile_rows, LANES), lambda i: (i, 0))
    out_spec = pl.BlockSpec((SUBLANES, LANES), lambda i: (i, 0))

    kernel = functools.partial(
        _focal_partial_kernel,
        gamma=float(gamma),
        total_rows=rows,
        tile_rows=tile_rows,
        mask_tail=mask_tail,
    )

    out_rows = grid_size * SUBLANES
    bytes_in = 2 * n * pred2d.dtype.itemsize
    bytes_out = 2 * out_rows * LANES * 4

    bce_part, pow_part = pl.pallas_call(
        kernel,
        out_shape=(
            jax.ShapeDtypeStruct((out_rows, LANES), jnp.float32),
            jax.ShapeDtypeStruct((out_rows, LANES), jnp.float32),
        ),
        grid_spec=pltpu.PrefetchScalarGridSpec(
            num_scalar_prefetch=0,
            grid=(grid_size,),
            in_specs=[in_spec, in_spec],
            out_specs=[out_spec, out_spec],
        ),
        compiler_params=pltpu.CompilerParams(
            dimension_semantics=("parallel",),   # per-block outputs -> safe to shard (v7x megacore)
        ),
        cost_estimate=pl.CostEstimate(
            flops=8 * n,
            transcendentals=2 * n,
            bytes_accessed=bytes_in + bytes_out,
        ),
    )(pred2d, tgt2d)

    count = jnp.float32(n)
    bce_mean = jnp.sum(bce_part) / count
    pow_mean = jnp.sum(pow_part) / count
    # out = mean(alpha * (1-p)**gamma * BCE) = alpha * BCE * mean((1-p)**gamma)
    return (alpha * bce_mean * pow_mean).astype(jnp.float32)


def _focal_loss_ref(pred, target, alpha=ALPHA, gamma=GAMMA):
    p = pred.astype(jnp.float32)
    t = target.astype(jnp.float32)
    bce = jnp.mean(-(t * jnp.maximum(jnp.log(p), -100.0)
                     + (1.0 - t) * jnp.maximum(jnp.log(1.0 - p), -100.0)))
    return jnp.mean(alpha * (1.0 - p) ** gamma * bce)


if __name__ == "__main__":
    key = jax.random.PRNGKey(0)
    k1, k2 = jax.random.split(key)
    # pred: probabilities in (0,1); target: soft labels in [0,1].
    pred = jax.random.uniform(k1, (2, 4, 16, 16), jnp.float32,
                              minval=1e-4, maxval=1.0 - 1e-4)
    target = jax.random.uniform(k2, (2, 4, 16, 16), jnp.float32)

    out = focal_loss(pred, target)
    out = jax.block_until_ready(out)

    ref = jax.block_until_ready(_focal_loss_ref(pred, target))
    np.testing.assert_allclose(np.asarray(out), np.asarray(ref),
                               rtol=1e-5, atol=1e-6)
    print("KERNEL_OK")
</pallas_src>

<mosaic_0001>
module attributes {stable_mosaic.version = 11 : i64} {
  func.func @_focal_partial_kernel(%arg0: i32, %arg1: memref<16x128xf32, #tpu.memory_space<vmem>>, %arg2: memref<16x128xf32, #tpu.memory_space<vmem>>, %arg3: memref<8x128xf32, #tpu.memory_space<vmem>>, %arg4: memref<8x128xf32, #tpu.memory_space<vmem>>) attributes {dimension_semantics = [#tpu.dimension_semantics<parallel>], iteration_bounds = array<i64: 1>, scalar_prefetch = 0 : i64, scratch_operands = 0 : i64, tpu.core_type = #tpu.core_type<tc>, window_params = [{transform_indices = @transform_0, window_bounds = array<i64: 16, 128>}, {transform_indices = @transform_1, window_bounds = array<i64: 16, 128>}, {transform_indices = @transform_2, window_bounds = array<i64: 8, 128>}, {transform_indices = @transform_3, window_bounds = array<i64: 8, 128>}]} {
    %c0 = arith.constant 0 : index
    %c0_0 = arith.constant 0 : index
    %0 = vector.load %arg1[%c0, %c0_0] : memref<16x128xf32, #tpu.memory_space<vmem>>, vector<16x128xf32>
    %c0_1 = arith.constant 0 : index
    %c0_2 = arith.constant 0 : index
    %1 = vector.load %arg2[%c0_1, %c0_2] : memref<16x128xf32, #tpu.memory_space<vmem>>, vector<16x128xf32>
    %2 = math.log %0 : vector<16x128xf32>
    %cst = arith.constant -1.000000e+02 : f32
    %3 = vector.broadcast %cst : f32 to vector<16x128xf32>
    %4 = arith.maximumf %2, %3 : vector<16x128xf32>
    %cst_3 = arith.constant 1.000000e+00 : f32
    %5 = vector.broadcast %cst_3 : f32 to vector<16x128xf32>
    %6 = arith.subf %5, %0 : vector<16x128xf32>
    %7 = math.log %6 : vector<16x128xf32>
    %cst_4 = arith.constant -1.000000e+02 : f32
    %8 = vector.broadcast %cst_4 : f32 to vector<16x128xf32>
    %9 = arith.maximumf %7, %8 : vector<16x128xf32>
    %10 = arith.mulf %1, %4 : vector<16x128xf32>
    %cst_5 = arith.constant 1.000000e+00 : f32
    %11 = vector.broadcast %cst_5 : f32 to vector<16x128xf32>
    %12 = arith.subf %11, %1 : vector<16x128xf32>
    %13 = arith.mulf %12, %9 : vector<16x128xf32>
    %14 = arith.addf %10, %13 : vector<16x128xf32>
    %cst_6 = arith.constant 0.000000e+00 : f32
    %15 = vector.broadcast %cst_6 : f32 to vector<16x128xf32>
    %16 = arith.subf %15, %14 : vector<16x128xf32>
    %cst_7 = arith.constant 1.000000e+00 : f32
    %17 = vector.broadcast %cst_7 : f32 to vector<16x128xf32>
    %18 = arith.subf %17, %0 : vector<16x128xf32>
    %19 = arith.mulf %18, %18 : vector<16x128xf32>
    %20 = vector.shape_cast %16 : vector<16x128xf32> to vector<2x8x128xf32>
    %cst_8 = arith.constant dense<0.000000e+00> : vector<8x128xf32>
    %21 = vector.multi_reduction <add>, %20, %cst_8 [0] : vector<2x8x128xf32> to vector<8x128xf32>
    %c0_9 = arith.constant 0 : index
    %c0_10 = arith.constant 0 : index
    %22 = vector.load %arg3[%c0_9, %c0_10] : memref<8x128xf32, #tpu.memory_space<vmem>>, vector<8x128xf32>
    tpu.vector_store %arg3[%c0_9, %c0_10], %21 {strides = array<i32>} : memref<8x128xf32, #tpu.memory_space<vmem>>, vector<8x128xf32>,
    %23 = vector.shape_cast %19 : vector<16x128xf32> to vector<2x8x128xf32>
    %cst_11 = arith.constant dense<0.000000e+00> : vector<8x128xf32>
    %24 = vector.multi_reduction <add>, %23, %cst_11 [0] : vector<2x8x128xf32> to vector<8x128xf32>
    %c0_12 = arith.constant 0 : index
    %c0_13 = arith.constant 0 : index
    %25 = vector.load %arg4[%c0_12, %c0_13] : memref<8x128xf32, #tpu.memory_space<vmem>>, vector<8x128xf32>
    tpu.vector_store %arg4[%c0_12, %c0_13], %24 {strides = array<i32>} : memref<8x128xf32, #tpu.memory_space<vmem>>, vector<8x128xf32>,
    return
  }
  func.func @transform_0(%arg0: i32) -> (i32, i32) {
    %c0_i32 = arith.constant 0 : i32
    %c0_i32_0 = arith.constant 0 : i32
    return %arg0, %c0_i32 : i32, i32
  }
  func.func @transform_1(%arg0: i32) -> (i32, i32) {
    %c0_i32 = arith.constant 0 : i32
    %c0_i32_0 = arith.constant 0 : i32
    return %arg0, %c0_i32 : i32, i32
  }
  func.func @transform_2(%arg0: i32) -> (i32, i32) {
    %c0_i32 = arith.constant 0 : i32
    %c0_i32_0 = arith.constant 0 : i32
    return %arg0, %c0_i32 : i32, i32
  }
  func.func @transform_3(%arg0: i32) -> (i32, i32) {
    %c0_i32 = arith.constant 0 : i32
    %c0_i32_0 = arith.constant 0 : i32
    return %arg0, %c0_i32 : i32, i32
  }
}

</mosaic_0001>

<bundles_post_ra>
// kernel: tpu_custom_call.1
= control target key start
LH: loop header
LB: loop body
LE: loop exit
PB: predicated region body
PF: predicated region fallthrough
CT: control target
= control target key end

     0   :  { %9 = vsyncpa [#allocation3], 0  ;;  %s291_s0 = inlined_call_operand.hbm [shape: f32[16,128], index: 0, kind: input, shape index: {}]   ;;  %s292_s1 = inlined_call_operand.hbm [shape: f32[16,128], index: 1, kind: input, shape index: {}]   ;;  %s293_s2 = inlined_call_operand.hbm [shape: f32[8,128], index: 2, kind: output, shape index: {0}]   ;;  %s294_s3 = inlined_call_operand.hbm [shape: f32[8,128], index: 3, kind: output, shape index: {1}]  }
   0x1   :  { %10 = vsyncpa [#allocation6], 0 }
   0x2   :  { %11 = vsyncpa [#allocation4], 0 }
   0x3   :  { %12 = vsyncpa [#allocation9], 0  ;;  %s217_s12 = smov [#allocation2]   ;;  %s121_s16 = scalar_lea.hbm %s291_s0, 256 }
   0x4   :  { %s18_s13 = sshll.u32 %s217_s12, 4  ;;  %p122_p0 = scmp.ne.s32.totalorder %s291_s0, %s121_s16  ;;  %s19_s13 = int_to_ptr.vmem [resolvable:$true] %s18_s13 }
   0x5   :  { %p125_p1 = scmp.lt.u32.totalorder %s121_s16, %s291_s0 }
   0x7   :  { %p127_p2 = pnand %p125_p1, %p122_p0 }
   0x9   :  { %130 = shalt.err (!%p127_p2)
}
   0xa   :  { %s131_s21 = scalar_lea.vmem %s19_s13, 256  ;;  %p136_p4 = scmp.lt.s32.totalorder %s19_s13, %s19_s13 }
   0xb   :  { %p132_p3 = scmp.ne.s32.totalorder %s19_s13, %s131_s21  ;;  %p137_p5 = scmp.lt.s32.totalorder %s131_s21, %s131_s21 }
   0xd   :  { %p138_p6 = por %p137_p5, %p136_p4 }
   0xf   :  { %p139_p7 = pnand %p138_p6, %p132_p3 }
  0x11   :  { %142 = shalt.err (!%p139_p7)
}
  0x12   :  { %s218_s22 = smov 128   ;;  %s219_s23 = smov 8  }
  0x13   :  { %24 = dma.hbm_to_vmem [thread:$0]  %s291_s0, 256, %s19_s13, [#allocation3], %s218_s22, %s218_s22, %s219_s23  }
  0x14   :  { %s220_s26 = smov [#allocation5]   ;;  %s143_s30 = scalar_lea.hbm %s292_s1, 256 }
  0x15   :  { %s30_s27 = sshll.u32 %s220_s26, 4  ;;  %p144_p8 = scmp.ne.s32.totalorder %s292_s1, %s143_s30  ;;  %s31_s27 = int_to_ptr.vmem [resolvable:$true] %s30_s27 }
  0x16   :  { %p147_p9 = scmp.lt.u32.totalorder %s143_s30, %s292_s1 }
  0x18   :  { %p149_p10 = pnand %p147_p9, %p144_p8 }
  0x1a   :  { %152 = shalt.err (!%p149_p10)
}
  0x1b   :  { %s153_s8 = scalar_lea.vmem %s31_s27, 256  ;;  %p158_p12 = scmp.lt.s32.totalorder %s31_s27, %s31_s27 }
  0x1c   :  { %p154_p11 = scmp.ne.s32.totalorder %s31_s27, %s153_s8  ;;  %p159_p13 = scmp.lt.s32.totalorder %s153_s8, %s153_s8 }
  0x1e   :  { %p160_p0 = por %p159_p13, %p158_p12 }
  0x20   :  { %p161_p1 = pnand %p160_p0, %p154_p11 }
  0x22   :  { %164 = shalt.err (!%p161_p1)
}
  0x23   :  { %36 = dma.hbm_to_vmem [thread:$0]  %s292_s1, 256, %s31_s27, [#allocation6], %s218_s22, %s218_s22, %s219_s23  }
  0x24   :  { %209 = dma.done.wait [#allocation3], 256  }
  0x25   :  { %210 = vsyncadd [#allocation3], 4294967040 }
  0x26   :  { %211 = dma.done.wait [#allocation6], 256  }
  0x27   :  { %212 = vsyncadd [#allocation6], 4294967040  ;;  %v43_v0 = vld [vmem:[#allocation2] sm:$0xff]  ;;  %v44_v1 = vld [vmem:[#allocation2 + $0x8] sm:$0xff]  ;;  %s221_s10 = smov [#allocation8]  }
  0x28   :  { %113 = vlog2.f32 %v43_v0  ;;  %v53_v2 = vsub.f32 1.0, %v43_v0  ;;  %v54_v3 = vsub.f32 1.0, %v44_v1  ;;  %s93_s11 = sshll.u32 %s221_s10, 4  ;;  %s94_s11 = int_to_ptr.vmem [resolvable:$true] %s93_s11 }
  0x29   :  { %115 = vlog2.f32 %v44_v1  ;;  %s165_s1 = scalar_lea.vmem %s94_s11, 128  ;;  %p170_p3 = scmp.lt.s32.totalorder %s94_s11, %s94_s11 }
  0x2a   :  { %117 = vlog2.f32 %v53_v2  ;;  %v71_v4 = vmul.f32 %v53_v2, %v53_v2  ;;  %v72_v5 = vmul.f32 %v54_v3, %v54_v3  ;;  %p166_p2 = scmp.ne.s32.totalorder %s94_s11, %s165_s1  ;;  %p171_p4 = scmp.lt.s32.totalorder %s165_s1, %s165_s1 }
  0x2b   :  { %119 = vlog2.f32 %v54_v3 }
  0x2c   :  { %v75_v6 = vadd.f32 %v72_v5, %v71_v4  ;;  %p172_p5 = por %p171_p4, %p170_p3 }
  0x2e   :  { %76 = vst [vmem:[#allocation8] sm:$0xff] %v75_v6  ;;  %p173_p6 = pnand %p172_p5, %p166_p2 }
  0x30   :  { %176 = shalt.err (!%p173_p6)
}
  0x31   :  { %s177_s14 = scalar_lea.hbm %s294_s3, 128 }
  0x32   :  { %p178_p7 = scmp.ne.s32.totalorder %s294_s3, %s177_s14  ;;  %p181_p8 = scmp.lt.u32.totalorder %s177_s14, %s294_s3 }
  0x34   :  { %p183_p9 = pnand %p181_p8, %p178_p7 }
  0x36   :  { %186 = shalt.err (!%p183_p9)
}
  0x37   :  { %96 = dma.vmem_to_hbm [thread:$0]  %s94_s11, 128, %s294_s3, [#allocation9]   ;;  %v114_v7 = vpop.eup %113  ;;  %v45_v8 = vld [vmem:[#allocation5] sm:$0xff]  ;;  %v46_v10 = vld [vmem:[#allocation5 + $0x8] sm:$0xff] }
  0x38   :  { %v116_v9 = vpop.eup %115  ;;  %v48_v11 = vmul.f32 0.6931472, %v114_v7  ;;  %v63_v17 = vsub.f32 1.0, %v45_v8  ;;  %v64_v20 = vsub.f32 1.0, %v46_v10  ;;  %s222_s3 = smov [#allocation7]  }
  0x39   :  { %v118_v12 = vpop.eup %117  ;;  %v50_v13 = vmul.f32 0.6931472, %v116_v9  ;;  %s83_s21 = sshll.u32 %s222_s3, 4  ;;  %s84_s21 = int_to_ptr.vmem [resolvable:$true] %s83_s21 }
  0x3a   :  { %v120_v14 = vpop.eup %119  ;;  %v51_v15 = vmax.f32 %v48_v11, -100.0  ;;  %v56_v16 = vmul.f32 0.6931472, %v118_v12  ;;  %s187_s22 = scalar_lea.vmem %s84_s21, 128  ;;  %p192_p11 = scmp.lt.s32.totalorder %s84_s21, %s84_s21 }
  0x3b   :  { %v52_v18 = vmax.f32 %v50_v13, -100.0  ;;  %v58_v19 = vmul.f32 0.6931472, %v120_v14  ;;  %p188_p10 = scmp.ne.s32.totalorder %s84_s21, %s187_s22  ;;  %p193_p12 = scmp.lt.s32.totalorder %s187_s22, %s187_s22 }
  0x3c   :  { %v59_v21 = vmax.f32 %v56_v16, -100.0  ;;  %v61_v22 = vmul.f32 %v51_v15, %v45_v8 }
  0x3d   :  { %v60_v23 = vmax.f32 %v58_v19, -100.0  ;;  %v62_v24 = vmul.f32 %v52_v18, %v46_v10  ;;  %p194_p13 = por %p193_p12, %p192_p11 }
  0x3e   :  { %v65_v25 = vmul.f32 %v63_v17, %v59_v21 }
  0x3f   :  { %v66_v26 = vmul.f32 %v64_v20, %v60_v23  ;;  %p195_p0 = pnand %p194_p13, %p188_p10 }
  0x40   :  { %v67_v27 = vadd.f32 %v65_v25, %v61_v22 }
  0x41   :  { %v68_v28 = vadd.f32 %v66_v26, %v62_v24 }
  0x42   :  { %v69_v29 = vsub.f32 0.0, %v67_v27 }
  0x43   :  { %v70_v30 = vsub.f32 0.0, %v68_v28 }
  0x45   :  { %v73_v31 = vadd.f32 %v70_v30, %v69_v29 }
  0x47   :  { %74 = vst [vmem:[#allocation7] sm:$0xff] %v73_v31 }
  0x48   :  { %198 = shalt.err (!%p195_p0)
}
  0x49   :  { %s199_s25 = scalar_lea.hbm %s293_s2, 128 }
  0x4a   :  { %p200_p1 = scmp.ne.s32.totalorder %s293_s2, %s199_s25  ;;  %p203_p2 = scmp.lt.u32.totalorder %s199_s25, %s293_s2 }
  0x4c   :  { %p205_p3 = pnand %p203_p2, %p200_p1 }
  0x4e   :  { %208 = shalt.err (!%p205_p3)
}
  0x4f   :  { %86 = dma.vmem_to_hbm [thread:$0]  %s84_s21, 128, %s293_s2, [#allocation4]  }
  0x50   :  { %213 = dma.done.wait [#allocation4], 128  }
  0x51   :  { %214 = vsyncadd [#allocation4], 4294967168 }
  0x52   :  { %215 = dma.done.wait [#allocation9], 128  }
  0x53   :  { %216 = vsyncadd [#allocation9], 4294967168 }
  0x54   :  { %103 = vsyncpa [#allocation3], 1 }
  0x55   :  { %104 = vsyncpa [#allocation6], 1 }
  0x56   :  { %105 = vsyncpa [#allocation4], 1 }
  0x57   :  { %106 = vsyncpa [#allocation9], 1 }

</bundles_post_ra>
